<compile_context>
chip_gen: v5e
topology: v5e:2x2
jax: 0.10.0
libtpu: 0.0.40
codegen_flags: <defaults>
</compile_context>

<pallas_src>
import functools
import math

import jax
import jax.numpy as jnp
from jax import lax
from jax.experimental import pallas as pl
from jax.experimental.pallas import tpu as pltpu


def _guided_attention_kernel(lt_ref, qlf_ref, klf_ref, sql_ref, skl_ref,
                             cdiv_ref, cmod_ref, align_ref, out_ref, *,
                             g, K, rows, acc_rows):
    b = pl.program_id(0)
    qt = pl.program_id(1)
    gK = g * K

    @pl.when(qt == 0)
    def _init():
        out_ref[...] = jnp.zeros_like(out_ref)

    # Steps that lie entirely in the zero-padded q region of batch b are skipped
    # (their alignments DMA is also skipped via the clamped index_map).
    @pl.when(qt <= lt_ref[b])
    def _compute():
        qlf = qlf_ref[b]            # query length (float)
        klf = klf_ref[b]            # key length (float)
        s_ql = sql_ref[b]           # 1 / (sqrt(2) * sigma * ql_b)
        s_kl = skl_ref[b]           # 1 / (sqrt(2) * sigma * kl_b)

        c_div = cdiv_ref[...]                       # (1, gK) q offset within fold group
        c_mod = cmod_ref[...]                       # (1, gK) k index
        col_term = c_div * s_ql - c_mod * s_kl      # (1, gK)
        k_valid = c_mod < klf                       # (1, gK)

        q0 = (qt * (rows * g)).astype(jnp.float32)
        r = lax.broadcasted_iota(jnp.int32, (rows, 1), 0).astype(jnp.float32)
        q_row = q0 + r * jnp.float32(g)             # (rows, 1) base q of each folded row
        row_term = q_row * s_ql                     # (rows, 1)

        diff = row_term + col_term                  # (rows, gK): single broadcast add
        mask_val = 1.0 - jnp.exp(-(diff * diff))    # sigma already folded into diff
        a = align_ref[...].astype(jnp.float32)
        prod = a * mask_val

        def _accumulate(x):
            if acc_rows == 8:
                # layout-preserving reshape -> pure vreg adds, no XLU reduce
                part = jnp.sum(x.reshape(-1, 8, gK), axis=0)
            else:
                part = jnp.sum(x, axis=0, keepdims=True)
            out_ref[...] += part.reshape(1, acc_rows, gK)

        interior = ((((qt + 1) * (rows * g)).astype(jnp.float32) <= qlf)
                    & (jnp.float32(K) <= klf))

        @pl.when(interior)
        def _fast():                 # fully valid tile: skip per-element select
            _accumulate(prod)

        @pl.when(jnp.logical_not(interior))
        def _edge():
            # q < ql  <=>  q_row < ql - c_div ; garbage/padded rows are q >= Q >= ql.
            valid = (q_row < (qlf - c_div)) & k_valid
            _accumulate(jnp.where(valid, prod, 0.0))


def guided_attention_loss(alignments, query_lengths, key_lengths, sigma=0.3,
                          block_rows=None):
    """alignments: [B, Q, K] (f32 or bf16); query_lengths/key_lengths: [B] ints.

    Assumes ql_b <= Q and kl_b <= K (alignments padded to the max lengths), as in
    the PyTorch module.
    """
    B, Q, K = alignments.shape
    itemsize = jnp.dtype(alignments.dtype).itemsize

    # ---- Lane folding: fold g consecutive q rows into the lane dim (free reshape).
    g = 1
    if K < 128:
        g_max = max(1, 128 // K)
        for cand in range(min(g_max, Q), 0, -1):
            if Q % cand == 0:
                g = cand
                break
    Qf = Q // g
    gK = g * K
    align_folded = alignments.reshape(B, Qf, gK)

    # ---- Generation-aware block sizing with lane-padding-aware VMEM accounting.
    try:
        vmem_cap = int(getattr(pltpu.get_tpu_info(), "vmem_capacity_bytes",
                               64 * 1024 * 1024))
    except Exception:  # conservative fallback (v7x per-core VMEM)
        vmem_cap = 64 * 1024 * 1024
    lane_gK = ((gK + 127) // 128) * 128               # real lane footprint
    per_block_target = min(8 * 1024 * 1024, vmem_cap // 12)
    if block_rows is None:
        rows = per_block_target // (lane_gK * itemsize)
        rows = max(8, (rows // 8) * 8)
        if rows >= Qf:
            rows = Qf                                  # full extent block
    else:
        rows = int(block_rows)
    n_qt = -(-Qf // rows)
    acc_rows = 8 if rows % 8 == 0 else 1

    rows_pad = ((rows + 7) // 8) * 8
    block_bytes = rows_pad * lane_gK * itemsize
    needed = 2 * block_bytes + 2 * 8 * lane_gK * 4 + (4 << 20)
    vmem_limit = int(min(max(needed, 32 << 20), (vmem_cap * 3) // 4))

    # ---- Wrapper-precomputed scalars / tiny constant vectors.
    qlf = query_lengths.astype(jnp.float32)
    klf = key_lengths.astype(jnp.float32)
    s = 1.0 / (math.sqrt(2.0) * float(sigma))    # exponent = -(q*s/ql - k*s/kl)^2
    s_ql = s / qlf
    s_kl = s / klf

    ql_i = query_lengths.astype(jnp.int32)
    folded_rows_needed = (ql_i + (g - 1)) // g
    tiles_needed = (folded_rows_needed + (rows - 1)) // rows
    last_tile = jnp.maximum(tiles_needed - 1, 0).astype(jnp.int32)

    col = jnp.arange(gK, dtype=jnp.int32)
    c_div = (col // K).astype(jnp.float32).reshape(1, gK)   # q offset within fold
    c_mod = (col % K).astype(jnp.float32).reshape(1, gK)    # k index

    kernel = functools.partial(_guided_attention_kernel,
                               g=g, K=K, rows=rows, acc_rows=acc_rows)

    cost = pl.CostEstimate(
        flops=8 * B * Q * K,
        transcendentals=B * Q * K,
        bytes_accessed=B * Q * K * itemsize + B * acc_rows * gK * 4 + 8 * B * 4)

    # TODO(synk): for v7x with B == 1 a second "parallel" grid axis splitting the
    # q-tile range would keep both TensorCores busy; skipped to keep the
    # padded-tile skipping logic simple.
    partials = pl.pallas_call(
        kernel,
        out_shape=jax.ShapeDtypeStruct((B, acc_rows, gK), jnp.float32),
        grid_spec=pltpu.PrefetchScalarGridSpec(
            num_scalar_prefetch=1,                       # last_tile [B] int32
            grid=(B, n_qt),
            in_specs=[
                pl.BlockSpec(memory_space=pltpu.MemorySpace.SMEM),   # qlf [B]
                pl.BlockSpec(memory_space=pltpu.MemorySpace.SMEM),   # klf [B]
                pl.BlockSpec(memory_space=pltpu.MemorySpace.SMEM),   # s/ql [B]
                pl.BlockSpec(memory_space=pltpu.MemorySpace.SMEM),   # s/kl [B]
                pl.BlockSpec((1, gK), lambda b, qt, lt: (0, 0)),     # c_div
                pl.BlockSpec((1, gK), lambda b, qt, lt: (0, 0)),     # c_mod
                # Clamp the tile index: steps past the valid length repeat the
                # previous block index, so Pallas skips the re-DMA.
                pl.BlockSpec((pl.Squeezed(), rows, gK),
                             lambda b, qt, lt: (b, jnp.minimum(qt, lt[b]), 0)),
            ],
            out_specs=pl.BlockSpec((1, acc_rows, gK),
                                   lambda b, qt, lt: (b, 0, 0)),
        ),
        compiler_params=pltpu.CompilerParams(
            dimension_semantics=("parallel", "arbitrary"),
            vmem_limit_bytes=vmem_limit),
        cost_estimate=cost,
    )(last_tile, qlf, klf, s_ql, s_kl, c_div, c_mod, align_folded)

    num = jnp.sum(partials)
    den = jnp.sum(qlf * klf)                 # denominator computed wrapper-side
    return num / den


def _reference(alignments, query_lengths, key_lengths, sigma=0.3):
    """Pure-JAX reference mirroring the PyTorch/numba code."""
    B, Q, K = alignments.shape
    q = jnp.arange(Q, dtype=jnp.float32)[None, :, None]
    k = jnp.arange(K, dtype=jnp.float32)[None, None, :]
    ql = query_lengths.astype(jnp.float32)[:, None, None]
    kl = key_lengths.astype(jnp.float32)[:, None, None]
    m = 1.0 - jnp.exp(-((q / ql - k / kl) ** 2) / (2.0 * sigma ** 2))
    valid = (q < ql) & (k < kl)
    masks = jnp.where(valid, m, 0.0)
    num = jnp.sum(alignments.astype(jnp.float32) * masks)
    den = jnp.sum((query_lengths * key_lengths).astype(jnp.float32))
    return num / den


if __name__ == "__main__":
    key = jax.random.PRNGKey(0)
    sigma = 0.3
    k1, k2, k3 = jax.random.split(key, 3)

    # Case 1: small padded batch; K=24 exercises lane folding (g=4, gK=96).
    a1 = jax.random.uniform(k1, (2, 16, 24), dtype=jnp.float32)
    ql1 = jnp.array([16, 12], dtype=jnp.int32)
    kl1 = jnp.array([24, 20], dtype=jnp.int32)
    ref1 = _reference(a1, ql1, kl1, sigma)
    out1 = jax.block_until_ready(guided_attention_loss(a1, ql1, kl1, sigma))
    assert jnp.allclose(out1, ref1, rtol=1e-5, atol=1e-6), (out1, ref1)

    # Case 2: multiple q tiles + padded-tile skipping (batch 1 only needs tile 0).
    a2 = jax.random.uniform(k2, (2, 64, 24), dtype=jnp.float32)
    ql2 = jnp.array([64, 24], dtype=jnp.int32)
    kl2 = jnp.array([24, 16], dtype=jnp.int32)
    ref2 = _reference(a2, ql2, kl2, sigma)
    out2 = jax.block_until_ready(
        guided_attention_loss(a2, ql2, kl2, sigma, block_rows=8))
    assert jnp.allclose(out2, ref2, rtol=1e-5, atol=1e-6), (out2, ref2)

    # Case 3: K >= 128 (no folding, 8-sublane accumulator path) + bf16 streaming.
    a3 = jax.random.uniform(k3, (2, 32, 128), dtype=jnp.float32)
    ql3 = jnp.array([32, 20], dtype=jnp.int32)
    kl3 = jnp.array([128, 100], dtype=jnp.int32)
    ref3 = _reference(a3, ql3, kl3, sigma)
    out3 = jax.block_until_ready(guided_attention_loss(a3, ql3, kl3, sigma))
    assert jnp.allclose(out3, ref3, rtol=1e-5, atol=1e-6), (out3, ref3)

    a3b = a3.astype(jnp.bfloat16)
    ref3b = _reference(a3b, ql3, kl3, sigma)
    out3b = jax.block_until_ready(guided_attention_loss(a3b, ql3, kl3, sigma))
    assert jnp.allclose(out3b, ref3b, rtol=2e-2, atol=2e-2), (out3b, ref3b)

    print("KERNEL_OK")
</pallas_src>

<mosaic_0001>
module attributes {stable_mosaic.version = 11 : i64} {
  func.func @_guided_attention_kernel(%arg0: i32, %arg1: i32, %arg2: memref<2xi32, #tpu.memory_space<smem>>, %arg3: memref<2xf32, #tpu.memory_space<smem>>, %arg4: memref<2xf32, #tpu.memory_space<smem>>, %arg5: memref<2xf32, #tpu.memory_space<smem>>, %arg6: memref<2xf32, #tpu.memory_space<smem>>, %arg7: memref<1x96xf32, #tpu.memory_space<vmem>>, %arg8: memref<1x96xf32, #tpu.memory_space<vmem>>, %arg9: memref<1x4x96xf32, #tpu.memory_space<vmem>>, %arg10: memref<1x1x96xf32, #tpu.memory_space<vmem>>) attributes {dimension_semantics = [#tpu.dimension_semantics<parallel>, #tpu.dimension_semantics<arbitrary>], iteration_bounds = array<i64: 2, 1>, scalar_prefetch = 1 : i64, scratch_operands = 0 : i64, tpu.core_type = #tpu.core_type<tc>, window_params = [{transform_indices = @transform_0, window_bounds = array<i64: 2>}, {transform_indices = @transform_1, window_bounds = array<i64: 2>}, {transform_indices = @transform_2, window_bounds = array<i64: 2>}, {transform_indices = @transform_3, window_bounds = array<i64: 2>}, {pipeline_mode = #tpu.pipeline_mode<synchronous>, transform_indices = @transform_4, window_bounds = array<i64: 1, 96>}, {pipeline_mode = #tpu.pipeline_mode<synchronous>, transform_indices = @transform_5, window_bounds = array<i64: 1, 96>}, {transform_indices = @transform_6, window_bounds = array<i64: 1, 4, 96>}, {transform_indices = @transform_7, window_bounds = array<i64: 1, 1, 96>}]} {
    %c0_i32 = arith.constant 0 : i32
    %0 = arith.cmpi eq, %arg1, %c0_i32 : i32
    %1 = arith.extui %0 : i1 to i32
    %c0_i32_0 = arith.constant 0 : i32
    %2 = arith.cmpi ne, %1, %c0_i32_0 : i32
    scf.if %2 {
      %cst = arith.constant 0.000000e+00 : f32
      %8 = vector.broadcast %cst : f32 to vector<1x1x96xf32>
      %c0 = arith.constant 0 : index
      %c0_2 = arith.constant 0 : index
      %c0_3 = arith.constant 0 : index
      %9 = vector.load %arg10[%c0, %c0_2, %c0_3] : memref<1x1x96xf32, #tpu.memory_space<vmem>>, vector<1x1x96xf32>
      tpu.vector_store %arg10[%c0, %c0_2, %c0_3], %8 {strides = array<i32>} : memref<1x1x96xf32, #tpu.memory_space<vmem>>, vector<1x1x96xf32>,
    } else {
    }
    %3 = arith.index_cast %arg0 : i32 to index
    %4 = memref.load %arg2[%3] : memref<2xi32, #tpu.memory_space<smem>>
    %5 = arith.cmpi sle, %arg1, %4 : i32
    %6 = arith.extui %5 : i1 to i32
    %c0_i32_1 = arith.constant 0 : i32
    %7 = arith.cmpi ne, %6, %c0_i32_1 : i32
    scf.if %7 {
      %8 = arith.index_cast %arg0 : i32 to index
      %9 = memref.load %arg3[%8] : memref<2xf32, #tpu.memory_space<smem>>
      %10 = arith.index_cast %arg0 : i32 to index
      %11 = memref.load %arg4[%10] : memref<2xf32, #tpu.memory_space<smem>>
      %12 = arith.index_cast %arg0 : i32 to index
      %13 = memref.load %arg5[%12] : memref<2xf32, #tpu.memory_space<smem>>
      %14 = arith.index_cast %arg0 : i32 to index
      %15 = memref.load %arg6[%14] : memref<2xf32, #tpu.memory_space<smem>>
      %c0 = arith.constant 0 : index
      %c0_2 = arith.constant 0 : index
      %16 = vector.load %arg7[%c0, %c0_2] : memref<1x96xf32, #tpu.memory_space<vmem>>, vector<1x96xf32>
      %c0_3 = arith.constant 0 : index
      %c0_4 = arith.constant 0 : index
      %17 = vector.load %arg8[%c0_3, %c0_4] : memref<1x96xf32, #tpu.memory_space<vmem>>, vector<1x96xf32>
      %18 = vector.broadcast %13 : f32 to vector<1x96xf32>
      %19 = arith.mulf %16, %18 : vector<1x96xf32>
      %20 = vector.broadcast %15 : f32 to vector<1x96xf32>
      %21 = arith.mulf %17, %20 : vector<1x96xf32>
      %22 = arith.subf %19, %21 : vector<1x96xf32>
      %23 = vector.broadcast %11 : f32 to vector<1x96xf32>
      %24 = arith.cmpf olt, %17, %23 : vector<1x96xf32>
      %c16_i32 = arith.constant 16 : i32
      %25 = arith.muli %arg1, %c16_i32 : i32
      %26 = arith.sitofp %25 : i32 to f32
      %27 = tpu.iota {dimensions = array<i32: 0>} : vector<4x1xi32>
      %28 = arith.sitofp %27 : vector<4x1xi32> to vector<4x1xf32>
      %cst = arith.constant 4.000000e+00 : f32
      %29 = vector.broadcast %cst : f32 to vector<4x1xf32>
      %30 = arith.mulf %28, %29 : vector<4x1xf32>
      %31 = vector.broadcast %26 : f32 to vector<4x1xf32>
      %32 = arith.addf %31, %30 : vector<4x1xf32>
      %33 = vector.broadcast %13 : f32 to vector<4x1xf32>
      %34 = arith.mulf %32, %33 : vector<4x1xf32>
      %35 = vector.broadcast %34 : vector<4x1xf32> to vector<4x96xf32>
      %36 = vector.broadcast %22 : vector<1x96xf32> to vector<4x96xf32>
      %37 = arith.addf %35, %36 : vector<4x96xf32>
      %38 = arith.mulf %37, %37 : vector<4x96xf32>
      %cst_5 = arith.constant 0.000000e+00 : f32
      %39 = vector.broadcast %cst_5 : f32 to vector<4x96xf32>
      %40 = arith.subf %39, %38 : vector<4x96xf32>
      %41 = math.exp %40 : vector<4x96xf32>
      %cst_6 = arith.constant 1.000000e+00 : f32
      %42 = vector.broadcast %cst_6 : f32 to vector<4x96xf32>
      %43 = arith.subf %42, %41 : vector<4x96xf32>
      %c0_7 = arith.constant 0 : index
      %c0_8 = arith.constant 0 : index
      %c0_9 = arith.constant 0 : index
      %44 = vector.load %arg9[%c0_7, %c0_8, %c0_9] : memref<1x4x96xf32, #tpu.memory_space<vmem>>, vector<1x4x96xf32>
      %45 = vector.shape_cast %44 : vector<1x4x96xf32> to vector<4x96xf32>
      %46 = arith.mulf %45, %43 : vector<4x96xf32>
      %c1_i32 = arith.constant 1 : i32
      %47 = arith.addi %arg1, %c1_i32 : i32
      %c16_i32_10 = arith.constant 16 : i32
      %48 = arith.muli %47, %c16_i32_10 : i32
      %49 = arith.sitofp %48 : i32 to f32
      %50 = arith.cmpf ole, %49, %9 : f32
      %cst_11 = arith.constant 2.400000e+01 : f32
      %51 = arith.cmpf ole, %cst_11, %11 : f32
      %52 = arith.andi %50, %51 : i1
      %53 = arith.extui %52 : i1 to i32
      %c0_i32_12 = arith.constant 0 : i32
      %54 = arith.cmpi ne, %53, %c0_i32_12 : i32
      scf.if %54 {
        %cst_14 = arith.constant dense<0.000000e+00> : vector<96xf32>
        %58 = vector.multi_reduction <add>, %46, %cst_14 [0] : vector<4x96xf32> to vector<96xf32>
        %59 = vector.shape_cast %58 : vector<96xf32> to vector<1x96xf32>
        %c0_15 = arith.constant 0 : index
        %c0_16 = arith.constant 0 : index
        %c0_17 = arith.constant 0 : index
        %60 = vector.load %arg10[%c0_15, %c0_16, %c0_17] : memref<1x1x96xf32, #tpu.memory_space<vmem>>, vector<1x1x96xf32>
        %61 = vector.shape_cast %59 : vector<1x96xf32> to vector<1x1x96xf32>
        %62 = arith.addf %60, %61 : vector<1x1x96xf32>
        %c0_18 = arith.constant 0 : index
        %c0_19 = arith.constant 0 : index
        %c0_20 = arith.constant 0 : index
        %63 = vector.load %arg10[%c0_18, %c0_19, %c0_20] : memref<1x1x96xf32, #tpu.memory_space<vmem>>, vector<1x1x96xf32>
        tpu.vector_store %arg10[%c0_18, %c0_19, %c0_20], %62 {strides = array<i32>} : memref<1x1x96xf32, #tpu.memory_space<vmem>>, vector<1x1x96xf32>,
      } else {
      }
      %true = arith.constant true
      %55 = arith.xori %52, %true : i1
      %56 = arith.extui %55 : i1 to i32
      %c0_i32_13 = arith.constant 0 : i32
      %57 = arith.cmpi ne, %56, %c0_i32_13 : i32
      scf.if %57 {
        %58 = vector.broadcast %9 : f32 to vector<1x96xf32>
        %59 = arith.subf %58, %16 : vector<1x96xf32>
        %60 = vector.broadcast %32 : vector<4x1xf32> to vector<4x96xf32>
        %61 = vector.broadcast %59 : vector<1x96xf32> to vector<4x96xf32>
        %62 = arith.cmpf olt, %60, %61 : vector<4x96xf32>
        %63 = vector.broadcast %24 : vector<1x96xi1> to vector<4x96xi1>
        %64 = arith.andi %62, %63 : vector<4x96xi1>
        %cst_14 = arith.constant 0.000000e+00 : f32
        %65 = vector.broadcast %cst_14 : f32 to vector<4x96xf32>
        %66 = arith.select %64, %46, %65 : vector<4x96xi1>, vector<4x96xf32>
        %cst_15 = arith.constant dense<0.000000e+00> : vector<96xf32>
        %67 = vector.multi_reduction <add>, %66, %cst_15 [0] : vector<4x96xf32> to vector<96xf32>
        %68 = vector.shape_cast %67 : vector<96xf32> to vector<1x96xf32>
        %c0_16 = arith.constant 0 : index
        %c0_17 = arith.constant 0 : index
        %c0_18 = arith.constant 0 : index
        %69 = vector.load %arg10[%c0_16, %c0_17, %c0_18] : memref<1x1x96xf32, #tpu.memory_space<vmem>>, vector<1x1x96xf32>
        %70 = vector.shape_cast %68 : vector<1x96xf32> to vector<1x1x96xf32>
        %71 = arith.addf %69, %70 : vector<1x1x96xf32>
        %c0_19 = arith.constant 0 : index
        %c0_20 = arith.constant 0 : index
        %c0_21 = arith.constant 0 : index
        %72 = vector.load %arg10[%c0_19, %c0_20, %c0_21] : memref<1x1x96xf32, #tpu.memory_space<vmem>>, vector<1x1x96xf32>
        tpu.vector_store %arg10[%c0_19, %c0_20, %c0_21], %71 {strides = array<i32>} : memref<1x1x96xf32, #tpu.memory_space<vmem>>, vector<1x1x96xf32>,
      } else {
      }
    } else {
    }
    return
  }
  func.func @transform_0(%arg0: i32, %arg1: i32, %arg2: memref<2xi32, #tpu.memory_space<smem>>) -> i32 {
    %c0_i32 = arith.constant 0 : i32
    %c0_i32_0 = arith.constant 0 : i32
    return %c0_i32 : i32
  }
  func.func @transform_1(%arg0: i32, %arg1: i32, %arg2: memref<2xi32, #tpu.memory_space<smem>>) -> i32 {
    %c0_i32 = arith.constant 0 : i32
    %c0_i32_0 = arith.constant 0 : i32
    return %c0_i32 : i32
  }
  func.func @transform_2(%arg0: i32, %arg1: i32, %arg2: memref<2xi32, #tpu.memory_space<smem>>) -> i32 {
    %c0_i32 = arith.constant 0 : i32
    %c0_i32_0 = arith.constant 0 : i32
    return %c0_i32 : i32
  }
  func.func @transform_3(%arg0: i32, %arg1: i32, %arg2: memref<2xi32, #tpu.memory_space<smem>>) -> i32 {
    %c0_i32 = arith.constant 0 : i32
    %c0_i32_0 = arith.constant 0 : i32
    return %c0_i32 : i32
  }
  func.func @transform_4(%arg0: i32, %arg1: i32, %arg2: memref<2xi32, #tpu.memory_space<smem>>) -> (i32, i32) {
    %c0_i32 = arith.constant 0 : i32
    %c0_i32_0 = arith.constant 0 : i32
    %c0_i32_1 = arith.constant 0 : i32
    return %c0_i32, %c0_i32_0 : i32, i32
  }
  func.func @transform_5(%arg0: i32, %arg1: i32, %arg2: memref<2xi32, #tpu.memory_space<smem>>) -> (i32, i32) {
    %c0_i32 = arith.constant 0 : i32
    %c0_i32_0 = arith.constant 0 : i32
    %c0_i32_1 = arith.constant 0 : i32
    return %c0_i32, %c0_i32_0 : i32, i32
  }
  func.func @transform_6(%arg0: i32, %arg1: i32, %arg2: memref<2xi32, #tpu.memory_space<smem>>) -> (i32, i32, i32) {
    %0 = arith.index_cast %arg0 : i32 to index
    %1 = memref.load %arg2[%0] : memref<2xi32, #tpu.memory_space<smem>>
    %2 = arith.minsi %arg1, %1 : i32
    %c0_i32 = arith.constant 0 : i32
    %c0_i32_0 = arith.constant 0 : i32
    return %arg0, %2, %c0_i32 : i32, i32, i32
  }
  func.func @transform_7(%arg0: i32, %arg1: i32, %arg2: memref<2xi32, #tpu.memory_space<smem>>) -> (i32, i32, i32) {
    %c0_i32 = arith.constant 0 : i32
    %c0_i32_0 = arith.constant 0 : i32
    %c0_i32_1 = arith.constant 0 : i32
    return %arg0, %c0_i32, %c0_i32_0 : i32, i32, i32
  }
}

</mosaic_0001>

<bundles_post_ra>
// kernel: tpu_custom_call.1
= control target key start
LH: loop header
LB: loop body
LE: loop exit
PB: predicated region body
PF: predicated region fallthrough
CT: control target
= control target key end

     0   :  { %s990_s30 = smov [#allocation3]   ;;  %s1293_s0 = inlined_call_operand.hbm [shape: s32[2], index: 0, kind: input, shape index: {}]   ;;  %s1294_s1 = inlined_call_operand.hbm [shape: f32[2], index: 1, kind: input, shape index: {}]   ;;  %s1295_s2 = inlined_call_operand.vmem [shape: f32[2], index: 2, kind: input, shape index: {}]   ;;  %s1296_s3 = inlined_call_operand.vmem [shape: f32[2], index: 3, kind: input, shape index: {}]   ;;  %s1297_s4 = inlined_call_operand.vmem [shape: f32[2], index: 4, kind: input, shape index: {}]   ;;  %s1298_s5 = inlined_call_operand.vmem [shape: f32[1,96], index: 5, kind: input, shape index: {}]   ;;  %s1299_s6 = inlined_call_operand.vmem [shape: f32[1,96], index: 6, kind: input, shape index: {}]   ;;  %s1300_s7 = inlined_call_operand.hbm [shape: f32[2,4,96], index: 7, kind: input, shape index: {}]   ;;  %s1301_s8 = inlined_call_operand.hbm [shape: f32[2,1,96], index: 8, kind: output, shape index: {}]  }
   0x1   :  { %1307 = sst [smem:[#allocation29_spill]] %s1294_s1  ;;  %s14_s29 = sshll.u32 %s1293_s0, 4  ;;  %s15_s29 = int_to_ptr.hbm [resolvable:$true] %s14_s29 }
   0x2   :  { %1308 = sst [smem:[#allocation30_spill]] %s1295_s2 }
   0x3   :  { %1309 = sst [smem:[#allocation31_spill]] %s1296_s3 }
   0x4   :  { %1310 = sst [smem:[#allocation32_spill]] %s1297_s4 }
   0x5   :  { %17 = dma.hbm_to_smem %s15_s29, 16, %s990_s30, [#allocation2] }
   0x6   :  { %932 = dma.done.wait [#allocation2], 16 }
   0x7   :  { %933 = vsyncadd [#allocation2], 4294967280 }
   0x8   :  { %20 = sfence }
   0x9   :  { %21 = vsyncpa [#allocation7], 0 }
   0xa   :  { %22 = vsyncpa [#allocation8], 0 }
   0xb   :  { %23 = vsyncpa [#allocation11], 0 }
   0xc   :  { %24 = vsyncpa [#allocation5], 0 }
   0xd   :  { %26 = vsyncpa [#allocation5 + $0x1], 0 }
   0xe   :  { %27 = vsyncpa [#allocation6], 0 }
   0xf   :  { %29 = vsyncpa [#allocation6 + $0x1], 0  ;;  %s1045_s9 = smov 0   ;;  %s1047_s10 = smov 0  }
  0x10   :  { %s1049_s11 = smov 0   ;;  %s1051_s0 = smov 0  }
  0x11   :  { %s1053_s12 = smov 0   ;;  %s1055_s13 = smov 0  }
  0x12   :  { %s1057_s14 = smov 0   ;;  %s1059_s15 = smov 0  }
  0x13   :  { %s1061_s16 = smov 0  }
  0x14 LB: > { %1311 = sst [smem:[#allocation23_spill]] %s964_s11  ;;  %s605_s17 = sadd.s32 4294967295, %s988_s16   ;;  %s988_s16 = sphi %s1061_s16, %s35_s16   ;;  %s984_s15 = sphi %s1059_s15, %s1342_s15   ;;  %s980_s14 = sphi %s1057_s14, %s1341_s14   ;;  %s976_s13 = sphi %s1055_s13, %s1335_s13   ;;  %s972_s12 = sphi %s1053_s12, %s1340_s12   ;;  %s968_s0 = sphi %s1051_s0, %s1339_s0   ;;  %s964_s11 = sphi %s1049_s11, %s1333_s11   ;;  %s960_s10 = sphi %s1047_s10, %s1338_s10   ;;  %s956_s9 = sphi %s1045_s9, %s1337_s9  }
  0x15   : > { %1312 = sst [smem:[#allocation24_spill]] %s976_s13  ;;  %s606_s18 = sadd.s32 4294967294, %s988_s16  }
  0x16   : > { %1313 = sst [smem:[#allocation25_spill]] %s988_s16  ;;  %p1092_p0 = scmp.eq.s32.totalorder %s605_s17, 0 }
  0x17   : > { %p224_p1 = scmp.ne.s32.totalorder %s964_s11, %s960_s10  ;;  %p225_p2 = scmp.eq.s32.totalorder %s605_s17, 1 }
  0x18   : > { %p230_p3 = scmp.ne.s32.totalorder %s960_s10, %s956_s9  ;;  %p231_p4 = scmp.eq.s32.totalorder %s606_s18, 1 }
  0x19   : > { %p609_p5 = scmp.ge.s32.totalorder %s988_s16, 1  ;;  %p1101_p6 = por %p225_p2, %p224_p1 }
  0x1a   : > { %p238_p7 = scmp.lt.s32.totalorder %s988_s16, 3  ;;  %p1106_p8 = por %p231_p4, %p230_p3 }
  0x1b   : > { %s1318_s3 = sld [smem:[#allocation31_spill]]  ;;  %s991_s18 = smov [#allocation10]  }
  0x1c   : > { %p1110_p9 = pnand %p609_p5, %p238_p7  ;;  %s1319_s1 = sld [smem:[#allocation29_spill]] }
  0x1d   : > { %s1320_s2 = sld [smem:[#allocation30_spill]]  ;;  %s992_s23 = smov [#allocation4]  }
  0x1e   : > { %p652_p10 = pneg %p1110_p9  ;;  %s993_s24 = smov [#allocation9]  }
  0x1f   : > { %s1321_s4 = sld [smem:[#allocation32_spill]]  ;;  %s994_s29 = smov [#allocation12]  }
  0x20   : > { %p653_p12 = pnand %p652_p10, %p1092_p0  ;;  %s177_s30 = sld [smem:[#allocation3 + %s984_s15]] }
  0x21   : > { %s270_s25 = sshll.u32 %s1318_s3, 4  ;;  %p201_p1 = scmp.ne.s32.totalorder %s972_s12, %s968_s0  ;;  %s271_s25 = int_to_ptr.vmem [resolvable:$true] %s270_s25 }
  0x22   : > { %s250_s28 = sshll.u32 %s1319_s1, 4  ;;  %p195_p2 = scmp.ne.s32.totalorder %s976_s13, %s972_s12  ;;  %s251_s28 = int_to_ptr.hbm [resolvable:$true] %s250_s28 }
  0x23   : > { %s260_s17 = sshll.u32 %s1320_s2, 4  ;;  %p1144_p3 = por %p1092_p0, %p201_p1  ;;  %s261_s17 = int_to_ptr.vmem [resolvable:$true] %s260_s17 }
  0x24   : > { %661 = dma.vmem_to_smem (!%p653_p12), %s271_s25, 16, %s991_s18, [#allocation11]  }
  0x25   : > { %655 = dma.hbm_to_smem (!%p653_p12), %s251_s28, 16, %s992_s23, [#allocation7]  }
  0x26   : > { %658 = dma.vmem_to_smem (!%p653_p12), %s261_s17, 16, %s993_s24, [#allocation8]  }
  0x27   : > { %s280_s1 = sshll.u32 %s1321_s4, 4  ;;  %s47_s25 = sadd.s32 1, %s984_s15  ;;  %s281_s1 = int_to_ptr.vmem [resolvable:$true] %s280_s1 }
  0x28   : > { %664 = dma.vmem_to_smem (!%p653_p12), %s281_s1, 16, %s994_s29, [#allocation11]  }
  0x29   : > { %p49_p13 = scmp.ge.s32.totalorder %s47_s25, 2  ;;  %p607_p4 = scmp.gt.s32.totalorder %s177_s30, 0 }
  0x2a   : > { %p196_p7 = scmp.eq.s32.totalorder %s988_s16, 0  ;;  %s214_s1 = sadd.s32 1, %s964_s11 }
  0x2b   : > { %s1344_s25 = smov (%p49_p13, %s47_s25), 0  ;;  %s1346_s30 = smov (%p607_p4, %s177_s30), 0 }
  0x2c   : > { %1322 = sst [smem:[#allocation26_spill]] %s1344_s25  ;;  %s183_s17 = ssub.s32 %s984_s15, %s1344_s25 }
  0x2d   : > { %s180_s28 = sld [smem:[#allocation3 + %s1344_s25]]  ;;  %p212_p5 = scmp.eq.s32.totalorder %s183_s17, 0 }
  0x2e   : > { %p197_p12 = por %p196_p7, %p195_p2  ;;  %p679_p13 = scmp.lt.s32.totalorder %s988_s16, 2 }
  0x2f   : > { %s1151_s23 = scalar_select %p212_p5, %s964_s11, %s214_s1  }
  0x30   : > { %p1154_p11 = pnand %p679_p13, %p197_p12  ;;  %s188_s27 = sadd.s32 1, %s976_s13 }
  0x31   : > { %1324 = sst [smem:[#allocation27_spill]] %s1151_s23  ;;  %s297_s1 = sand.u32 1, %s976_s13  }
  0x32   : > { %s638_s29 = scalar_select %p197_p12, [#allocation3], [#allocation15] }
  0x33   : > { %p608_p10 = scmp.gt.s32.totalorder %s180_s28, 0  ;;  %s615_s25 = sshll.u32 %s297_s1, 2 }
  0x34   : > { %s639_s3 = scalar_select %p197_p12, %s984_s15, 0 }
  0x35   : > { %s1348_s28 = smov (%p608_p10, %s180_s28), 0  ;;  %s1350_s29 = smov (!%p679_p13, %s638_s29), [#allocation16] }
  0x36   : > { %s184_s24 = ssub.s32 %s1346_s30, %s1348_s28  ;;  %s1352_s3 = smov (!%p679_p13, %s639_s3), 0 }
  0x37   : > { %s185_s26 = sor.u32 %s184_s24, %s183_s17  ;;  %s302_s4 = sld [smem:[%s1350_s29 + %s1352_s3]] }
  0x38   : > { %p186_p1 = scmp.eq.s32.totalorder %s185_s26, 0  ;;  %s301_s23 = scalar_lea.vmem [#allocation13], %s615_s25 }
  0x39   : > { %s313_s11 = sshll.u32 %s301_s23, 4  ;;  %p842_p5 = pneg %p1154_p11  ;;  %s314_s11 = int_to_ptr.vmem [resolvable:$true] %s313_s11 }
  0x3a   : > { %s1160_s2 = scalar_select %p186_p1, %s976_s13, %s188_s27  }
  0x3b   : > { %s298_s27 = scalar_lea.sflag [#allocation5], %s297_s1 }
  0x3c   : > { %1326 = sst [smem:[#allocation28_spill]] %s1160_s2 }
  0x3d   : > { %p616_p2 = scmp.gt.s32.totalorder %s302_s4, 0 }
  0x3f   : > { %s1354_s4 = smov (%p616_p2, %s302_s4), 0 }
  0x40   : > { %s307_s16 = sadd.s32 %s984_s15, %s1354_s4  ;;  %s845_s4 = scalar_lea.hbm %s1300_s7, 8 }
  0x41   : > { %s617_s30 = sshll.u32 %s307_s16, 2 }
  0x42   : > { %s309_s24 = scalar_lea.hbm %s1300_s7, %s617_s30 }
  0x43   : > { %s311_s26 = sshll.u32 %s309_s24, 4  ;;  %s312_s26 = int_to_ptr.hbm [resolvable:$true] %s311_s26 }
  0x44   : > { %s838_s2 = sshra.s32 %s312_s26, 4  ;;  %s839_s2 = int_to_ptr.hbm [resolvable:$true] %s838_s2 }
  0x45   : > { %s840_s13 = scalar_lea.hbm %s839_s2, 4  ;;  %p846_p12 = scmp.lt.s32.totalorder %s839_s2, %s1300_s7 }
  0x46   : > { %p841_p4 = scmp.ne.s32.totalorder %s839_s2, %s840_s13  ;;  %p847_p13 = scmp.lt.s32.totalorder %s845_s4, %s840_s13 }
  0x48   : > { %p843_p7 = pnand %p842_p5, %p841_p4  ;;  %p848_p1 = por %p847_p13, %p846_p12 }
  0x4a   : > { %p844_p10 = pneg %p843_p7 }
  0x4c   : > { %p849_p2 = pnand %p848_p1, %p844_p10 }
  0x4e   : > { %852 = shalt.err (!%p849_p2)
}
  0x4f   : > { %670 = dma.hbm_to_vmem [thread:$0]  (!%p1154_p11), %s312_s26, 64, %s314_s11, %s298_s27  }
  0x50   : > { %322 = sbr.rel (%p1110_p9) target bundleno = 192 (0xc0), region = 48 }
  0x55   : > { %935 = dma.done.wait (%p1092_p0), [#allocation7], 16  }
  0x56   : > { %937 = vsyncadd (%p1092_p0), [#allocation7], 4294967280 }
  0x57   : > { %939 = dma.done.wait (%p1092_p0), [#allocation8], 16  }
  0x58   : > { %941 = vsyncadd (%p1092_p0), [#allocation8], 4294967280 }
  0x59   : > { %943 = dma.done.wait (%p1092_p0), [#allocation11], 32  }
  0x5a   : > { %945 = vsyncadd (%p1092_p0), [#allocation11], 4294967264  ;;  %s344_s2 = sand.u32 1, %s972_s12  }
  0x5b   : > { %s1193_s11 = sshll.u32 %s344_s2, 2  ;;  %s345_s13 = scalar_lea.sflag [#allocation5], %s344_s2 }
  0x5c   : > { %s348_s22 = scalar_lea.vmem [#allocation13], %s1193_s11 }
  0x5d   : > { %947 = dma.done.wait (%p1144_p3), %s345_s13, 64  }
  0x5e   : > { %949 = vsyncadd (%p1144_p3), %s345_s13, 4294967232 }
  0x5f   : > { %354 = sfence }
  0x60   : > { %s378_s0 = sand.u32 1, %s960_s10   ;;  %vm387_vm0 = vcmask 778240   ;;  %s389_s19 = sld [smem:[#allocation3 + %s980_s14]]  ;;  %v995_v0 = vmov 0.0  }
  0x61   : > { %s1204_s29 = scalar_lea.vmem [#allocation14], %s378_s0 }
  0x62   : > { %388 = vst.msk [vmem:[%s1204_s29] sm:$0x1] %vm387_vm0, %v995_v0 }
  0x66   : > { %p625_p0 = scmp.lt.s32.totalorder %s389_s19, 0 }
  0x67   : > { %s1209_s18 = sld [smem:[#allocation4 + %s980_s14]] (!%p625_p0) }
  0x68   : > { %393 = sbr.rel (%p625_p0) target bundleno = 178 (0xb2), region = 76  ;;  %s395_s1 = sld [smem:[#allocation9 + %s980_s14]] (!%p625_p0) }
  0x69   : > { %s396_s30 = sld [smem:[#allocation10 + %s980_s14]] (!%p625_p0) }
  0x6a   : > { %s397_s28 = sld [smem:[#allocation12 + %s980_s14]] (!%p625_p0) }
  0x6d   : > { %v409_v1 = vlaneseq  ;;  %v398_v4 = vld [vmem:[%s1298_s5] sm:$0x1]  ;;  %p626_p9 = scmp.ge.f32.partialorder %s1209_s18, 16.0 }
  0x6e   : > { %v399_v5 = vld [vmem:[%s1299_s6] sm:$0x1]  ;;  %v405_v6 = vstv %s395_s1  ;;  %p627_p11 = scmp.ge.f32.partialorder %s395_s1, 24.0 }
  0x6f   : > { %v410_v2 = vshrl.u32 %v409_v1, 7  ;;  %v400_v7 = vstv %s396_s30  ;;  %vm1221_vm1 = vcmp.lt.f32.partialorder %v399_v5, %v405_v6  ;;  %v425_v21 = vld [vmem:[%s348_s22] sm:$0xf] }
  0x70   : > { %v401_v10 = vmul.f32 %v400_v7, %v398_v4  ;;  %v402_v11 = vstv %s397_s28  ;;  %p1225_p3 = pnand %p627_p11, %p626_p9 }
  0x71   : > { %v411_v3 = vcvt.s32.f32 %v410_v2  ;;  %v403_v12 = vmul.f32 %v402_v11, %v399_v5 }
  0x73   : > { %v412_v9 = vmul.f32 4.0, %v411_v3  ;;  %v404_v13 = vsub.f32 %v401_v10, %v403_v12 }
  0x75   : > { %v415_v14 = vmul.f32 %v412_v9, %v400_v7  ;;  %v417_v15 = vperm.slane %v404_v13, 0 }
  0x77   : > { %v419_v16 = vadd.f32 %v417_v15, %v415_v14 }
  0x79   : > { %v420_v17 = vmul.f32 %v419_v16, %v419_v16 }
  0x7b   : > { %v421_v18 = vsub.f32 0.0, %v420_v17 }
  0x7d   : > { %v422_v19 = vmul.f32 1.442695, %v421_v18 }
  0x7f   : > { %764 = vpow2.f32 %v422_v19 }
  0x84   : > { %435 = sbr.rel (%p1225_p3) target bundleno = 154 (0x9a), region = 80 }
  0x85   : > { %v765_v20 = vpop.eup %764 }
  0x86   : > { %v424_v22 = vsub.f32 1.0, %v765_v20 }
  0x88   : > { %v426_v23 = vmul.f32 %v425_v21, %v424_v22 }
  0x89   : > { %vm436_vm2 = vcmask 781312   ;;  %v444_v30 = vld [vmem:[%s1204_s29] sm:$0x1] }
  0x8a   : > { %v437_v24 = vsel %vm436_vm2, %v426_v23, 0.0 }
  0x8b   : > { %v438_v25 = vrot.slane %v437_v24, 4 }
  0x8d   : > { %v439_v26 = vadd.f32 %v438_v25, %v437_v24 }
  0x8f   : > { %v440_v27 = vrot.slane %v439_v26, 2 }
  0x91   : > { %v441_v28 = vadd.f32 %v440_v27, %v439_v26 }
  0x93   : > { %v442_v29 = vrot.slane %v441_v28, 1 }
  0x95   : > { %v443_v31 = vadd.f32 %v442_v29, %v441_v28 }
  0x97   : > { %v445_v32 = vadd.f32 %v444_v30, %v443_v31 }
  0x99   : > { %447 = vst.msk [vmem:[%s1204_s29] sm:$0x1] %vm387_vm0, %v445_v32 }
  0x9a PF: > { %450 = sbr.rel (!%p1225_p3) target bundleno = 178 (0xb2), region = 84  ;;  %v451_v33 = vstv (%p1225_p3), %s1209_s18  ;;  %v996_v35 = vmov (%p1225_p3), 0   ;;  %vm462_vm5 = vcmask (%p1225_p3), 781312  }
  0x9b   : > { %v452_v34 = vsub.f32 (%p1225_p3), %v451_v33, %v398_v4  ;;  %v457_v36 = vsel (%p1225_p3), %vm1221_vm1, 1, %v996_v35 }
  0x9c   : > { %v458_v37 = vperm.slane (%p1225_p3), %v457_v36, 0 }
  0x9d   : > { %v454_v38 = vperm.slane (%p1225_p3), %v452_v34, 0 }
  0x9e   : > { %vm459_vm3 = vcmp.eq.s32.totalorder (%p1225_p3), %v458_v37, 1 }
  0x9f   : > { %vm456_vm4 = vcmp.lt.f32.partialorder %v412_v9, %v454_v38 }
  0xa0   : > { %vm460_vm6 = vmand %vm456_vm4, %vm459_vm3  ;;  %v470_v46 = vld [vmem:[%s1204_s29] sm:$0x1] }
  0xa1   : > { %v461_v39 = vsel %vm460_vm6, %v426_v23, 0.0 }
  0xa2   : > { %v463_v40 = vsel %vm462_vm5, %v461_v39, 0.0 }
  0xa3   : > { %v464_v41 = vrot.slane %v463_v40, 4 }
  0xa5   : > { %v465_v42 = vadd.f32 %v464_v41, %v463_v40 }
  0xa7   : > { %v466_v43 = vrot.slane %v465_v42, 2 }
  0xa9   : > { %v467_v44 = vadd.f32 %v466_v43, %v465_v42 }
  0xab   : > { %v468_v45 = vrot.slane %v467_v44, 1 }
  0xad   : > { %v469_v47 = vadd.f32 %v468_v45, %v467_v44 }
  0xaf   : > { %v471_v48 = vadd.f32 %v470_v46, %v469_v47 }
  0xb1   : > { %473 = vst.msk [vmem:[%s1204_s29] sm:$0x1] %vm387_vm0, %v471_v48 }
  0xb2 PF: > { %s483_s16 = scalar_lea.hbm %s1301_s8, %s980_s14  ;;  %s485_s23 = sshll.u32 %s1204_s29, 4  ;;  %s486_s23 = int_to_ptr.vmem [resolvable:$true] %s485_s23 }
  0xb3   : > { %s487_s2 = sshll.u32 %s483_s16, 4  ;;  %s475_s11 = scalar_lea.sflag [#allocation6], %s378_s0  ;;  %s488_s2 = int_to_ptr.hbm [resolvable:$true] %s487_s2 }
  0xb4   : > { %s882_s13 = sshra.s32 %s488_s2, 4  ;;  %s888_s1 = scalar_lea.hbm %s1301_s8, 2  ;;  %s883_s13 = int_to_ptr.hbm [resolvable:$true] %s882_s13 }
  0xb5   : > { %s884_s22 = scalar_lea.hbm %s883_s13, 1  ;;  %p889_p10 = scmp.lt.s32.totalorder %s883_s13, %s1301_s8 }
  0xb6   : > { %p885_p4 = scmp.ne.s32.totalorder %s883_s13, %s884_s22  ;;  %p890_p12 = scmp.lt.s32.totalorder %s888_s1, %s884_s22 }
  0xb8   : > { %p886_p5 = pnand %p885_p4, %p1101_p6  ;;  %p891_p13 = por %p890_p12, %p889_p10 }
  0xba   : > { %p887_p7 = pneg %p886_p5 }
  0xbc   : > { %p892_p1 = pnand %p891_p13, %p887_p7 }
  0xbe   : > { %895 = shalt.err (!%p892_p1)
}
  0xbf   : > { %650 = dma.vmem_to_hbm [thread:$0]  (%p1101_p6), %s486_s23, 16, %s488_s2, %s475_s11  }
  0xc0 PF: > { %s1330_s14 = sld [smem:[#allocation25_spill]]  ;;  %s499_s0 = sand.u32 1, %s956_s9  }
  0xc1   : > { %s500_s29 = scalar_lea.sflag [#allocation6], %s499_s0 }
  0xc6   : > { %p1331_p2 = scmp.ge.s32.totalorder %s1330_s14, 2 }
  0xc8   : > { %p672_p0 = pnand %p1331_p2, %p1106_p8 }
  0xca   : > { %p673_p9 = pneg %p672_p0 }
  0xcc   : > { %951 = dma.done.wait (%p673_p9), %s500_s29, 16  }
  0xcd   : > { %953 = vsyncadd (%p673_p9), %s500_s29, 4294967280  ;;  %s35_s16 = sadd.s32 1, %s1330_s14   ;;  %s1332_s17 = sld [smem:[#allocation23_spill]] }
  0xce   : > { %p32_p11 = scmp.ge.s32.totalorder %s35_s16, 4   ;;  %s1333_s11 = sld [smem:[#allocation27_spill]] }
  0xcf   : > { %s1334_s20 = sld [smem:[#allocation24_spill]]  ;;  %s1337_s9 = smov %s960_s10 }
  0xd0   : > { %s1335_s13 = sld [smem:[#allocation28_spill]]  ;;  %s1339_s0 = smov %s972_s12 }
  0xd1   : > { %s1336_s24 = sld [smem:[#allocation26_spill]]  ;;  %s1341_s14 = smov %s984_s15 }
  0xd3   : > { %s1338_s10 = smov %s1332_s17  ;;  %34 = sbr.rel (!%p32_p11) target bundleno = 20 (0x14), region = 127 }
  0xd5   : > { %s1340_s12 = smov %s1334_s20 }
  0xd7   : > { %s1342_s15 = smov %s1336_s24 }
  0xd8   :  { %505 = vsyncpa [#allocation5], 1 }
  0xd9   :  { %507 = vsyncpa [#allocation5 + $0x1], 1 }
  0xda   :  { %508 = vsyncpa [#allocation6], 1 }
  0xdb   :  { %510 = vsyncpa [#allocation6 + $0x1], 1 }
  0xdc   :  { %511 = vsyncpa [#allocation7], 1 }
  0xdd   :  { %513 = vsyncpa [#allocation7 + $0x1], 1 }
  0xde   :  { %514 = vsyncpa [#allocation8], 1 }
  0xdf   :  { %516 = vsyncpa [#allocation8 + $0x1], 1 }
  0xe0   :  { %517 = vsyncpa [#allocation11], 1 }

</bundles_post_ra>
